<compile_context>
chip_gen: v5e
topology: v5e:2x2
jax: 0.10.0
libtpu: 0.0.40
codegen_flags: <defaults>
</compile_context>

<pallas_src>
import jax
import jax.numpy as jnp
from jax.experimental import pallas as pl
from jax.experimental.pallas import tpu as pltpu


def _round_up(x, m):
    return (x + m - 1) // m * m


def highway_kernel(y_ref, w_ref, b_ref, z_ref):
    y = y_ref[...]                                   # (TB, F_pad) float32
    # One wide matmul: [t_pre | g_pre] = y @ [Wt | Wg] + [bt | bg]
    tg = jnp.dot(y.astype(w_ref.dtype), w_ref[...],
                 preferred_element_type=jnp.float32) + b_ref[...]
    tg = jnp.maximum(tg, 0.0)                        # ReLU on both halves
    f = y.shape[-1]                                  # F_pad (multiple of 128)
    t = tg[:, :f]
    g = tg[:, f:]
    # highway combine: z = t*g + (1 - t)*y  ==  t*(g - y) + y   (f32)
    z_ref[...] = (t * (g - y) + y).astype(z_ref.dtype)


def prepare_highway_params(w_t, b_t, w_g, b_g, *, mxu_dtype=jnp.bfloat16):
    """Hoisted (run once): pad feature dim to a multiple of 128, concatenate
    the two weight matrices along the output dim and cast for the MXU.
    Weights are (in, out) = PyTorch (out, in) transposed."""
    F = w_t.shape[0]
    F_pad = _round_up(F, 128)
    pad2 = ((0, F_pad - F), (0, F_pad - F))
    w_cat = jnp.concatenate(
        [jnp.pad(w_t, pad2), jnp.pad(w_g, pad2)], axis=1).astype(mxu_dtype)
    b_cat = jnp.concatenate(
        [jnp.pad(b_t, (0, F_pad - F)), jnp.pad(b_g, (0, F_pad - F))]
    ).reshape(1, 2 * F_pad).astype(jnp.float32)
    return w_cat, b_cat


def _pick_batch_tile(B, block_b):
    """Sublane-aligned batch tile; >= 2 grid blocks when the batch permits
    (keeps both v7x TensorCores busy on the 'parallel' axis)."""
    tb = min(block_b, B)
    if B >= 16:
        tb = min(tb, (B + 1) // 2)
    if tb < B:
        tb = min(_round_up(tb, 8), B)
    return tb  # if tb == B it equals the full array dim (always legal)


def highway_network(y, w_cat, b_cat, *, block_b=512, out_dtype=None):
    """y: (B, F) float32.  w_cat: (F_pad, 2*F_pad) MXU dtype.  b_cat: (1, 2*F_pad) f32."""
    B, F = y.shape
    F_pad = w_cat.shape[0]
    assert w_cat.shape == (F_pad, 2 * F_pad) and b_cat.shape == (1, 2 * F_pad)
    out_dtype = y.dtype if out_dtype is None else jnp.dtype(out_dtype)

    # Only the feature axis is ever padded (and only when F % 128 != 0);
    # the batch axis is handled by a partial last grid block.
    y_in = y if F_pad == F else jnp.pad(y, ((0, 0), (0, F_pad - F)))

    TB = _pick_batch_tile(B, block_b)
    grid = (pl.cdiv(B, TB),)

    w_bytes = jnp.dtype(w_cat.dtype).itemsize
    y_bytes = jnp.dtype(y.dtype).itemsize
    o_bytes = jnp.dtype(out_dtype).itemsize

    # Advisory cost estimate for XLA scheduling around the custom call.
    cost = pl.CostEstimate(
        flops=int(2 * B * F_pad * (2 * F_pad) + 6 * B * F_pad),
        transcendentals=0,
        bytes_accessed=int(B * F_pad * (y_bytes + o_bytes)
                           + 2 * F_pad * F_pad * w_bytes
                           + 2 * F_pad * 4),
    )

    def _vmem_limit(weight_bufs):
        needed = (
            2 * TB * F_pad * y_bytes                       # y, double-buffered
            + 2 * TB * F_pad * o_bytes                     # z, double-buffered
            + weight_bufs * (2 * F_pad * F_pad * w_bytes + 2 * F_pad * 4)
            + TB * 2 * F_pad * 4                           # t/g f32 intermediate
        )
        try:
            cap = getattr(pltpu.get_tpu_info(), "vmem_capacity_bytes", 64 << 20)
        except Exception:
            cap = 64 << 20
        # headroom for compiler scratch; no double-counted hedge on `needed`.
        return int(min(max(needed + (4 << 20), 32 << 20), int(cap * 0.85)))

    def _build(weight_mode, weight_bufs):
        extra = {} if weight_mode is None else {"pipeline_mode": weight_mode}
        in_specs = [
            pl.BlockSpec((TB, F_pad), lambda i: (i, 0)),               # y (tiled)
            pl.BlockSpec((F_pad, 2 * F_pad), lambda i: (0, 0), **extra),  # [Wt|Wg]
            pl.BlockSpec((1, 2 * F_pad), lambda i: (0, 0), **extra),      # [bt|bg]
        ]
        return pl.pallas_call(
            highway_kernel,
            out_shape=jax.ShapeDtypeStruct((B, F_pad), out_dtype),
            grid_spec=pltpu.PrefetchScalarGridSpec(
                num_scalar_prefetch=0,
                grid=grid,
                in_specs=in_specs,
                out_specs=pl.BlockSpec((TB, F_pad), lambda i: (i, 0)),
            ),
            compiler_params=pltpu.CompilerParams(
                dimension_semantics=("parallel",),
                vmem_limit_bytes=_vmem_limit(weight_bufs),
            ),
            cost_estimate=cost,
        )

    try:
        # Grid-invariant weights/bias: request single-buffering (saves half the
        # weight VMEM footprint; matters most on v7x's 64 MiB).
        out = _build(pl.Buffered(1), 1)(y_in, w_cat, b_cat)
    except Exception:
        # Fallback for JAX versions that reject Buffered(1) on invariant blocks.
        out = _build(None, 2)(y_in, w_cat, b_cat)

    return out if F_pad == F else out[:, :F]


def init_params(key, input_size):
    """Matches the PyTorch module's init:
    - transform_gate Linear: weight ~ U(-0.05, 0.05), bias = -2.0
    - affine_transformation Linear: weight & bias ~ U(-0.05, 0.05)
    Weights stored as (in, out) = PyTorch (out, in) transposed."""
    k1, k2, k3 = jax.random.split(key, 3)
    w_t = jax.random.uniform(k1, (input_size, input_size), jnp.float32, -0.05, 0.05)
    b_t = jnp.full((input_size,), -2.0, dtype=jnp.float32)
    w_g = jax.random.uniform(k2, (input_size, input_size), jnp.float32, -0.05, 0.05)
    b_g = jax.random.uniform(k3, (input_size,), jnp.float32, -0.05, 0.05)
    return w_t, b_t, w_g, b_g


def highway_reference(y, w_t, b_t, w_g, b_g):
    t = jnp.maximum(y @ w_t + b_t, 0.0)
    g = jnp.maximum(y @ w_g + b_g, 0.0)
    return t * g + (1.0 - t) * y


if __name__ == "__main__":
    key = jax.random.PRNGKey(0)
    k_in, k_p, k_b = jax.random.split(key, 3)

    batch = 40          # not a multiple of the batch tile -> partial last block
    input_size = 64     # padded to 128 lanes inside prepare_highway_params

    y = jax.random.normal(k_in, (batch, input_size), dtype=jnp.float32)
    w_t, b_t, w_g, b_g = init_params(k_p, input_size)

    # Check 1: module-faithful init (gate bias = -2.0). Default large tile ->
    # 2 grid blocks (megacore path) with a partial last block.
    w_cat, b_cat = prepare_highway_params(w_t, b_t, w_g, b_g)
    z = jax.block_until_ready(highway_network(y, w_cat, b_cat))
    z_ref = highway_reference(y, w_t, b_t, w_g, b_g)
    assert z.shape == (batch, input_size)
    assert jnp.allclose(z, z_ref, atol=2e-2, rtol=2e-2), "mismatch (module init)"

    # Check 2: random gate bias so the transform-gate path is actually active,
    # small tile to exercise a multi-step pipelined batch grid.
    b_t2 = jax.random.uniform(k_b, (input_size,), jnp.float32, -0.5, 0.5)
    w_cat2, b_cat2 = prepare_highway_params(w_t, b_t2, w_g, b_g)
    z2 = jax.block_until_ready(highway_network(y, w_cat2, b_cat2, block_b=16))
    z2_ref = highway_reference(y, w_t, b_t2, w_g, b_g)
    assert jnp.allclose(z2, z2_ref, atol=2e-2, rtol=2e-2), "mismatch (active gate)"

    print("KERNEL_OK")
</pallas_src>

<mosaic_0001>
module attributes {stable_mosaic.version = 11 : i64} {
  func.func @highway_kernel(%arg0: i32, %arg1: memref<24x128xf32, #tpu.memory_space<vmem>>, %arg2: memref<128x256xbf16, #tpu.memory_space<vmem>>, %arg3: memref<1x256xf32, #tpu.memory_space<vmem>>, %arg4: memref<24x128xf32, #tpu.memory_space<vmem>>) attributes {dimension_semantics = [#tpu.dimension_semantics<parallel>], iteration_bounds = array<i64: 2>, scalar_prefetch = 0 : i64, scratch_operands = 0 : i64, tpu.core_type = #tpu.core_type<tc>, window_params = [{transform_indices = @transform_0, window_bounds = array<i64: 24, 128>}, {pipeline_mode = #tpu.pipeline_mode<synchronous>, transform_indices = @transform_1, window_bounds = array<i64: 128, 256>}, {pipeline_mode = #tpu.pipeline_mode<synchronous>, transform_indices = @transform_2, window_bounds = array<i64: 1, 256>}, {transform_indices = @transform_3, window_bounds = array<i64: 24, 128>}]} {
    %c0 = arith.constant 0 : index
    %c0_0 = arith.constant 0 : index
    %0 = vector.load %arg1[%c0, %c0_0] : memref<24x128xf32, #tpu.memory_space<vmem>>, vector<24x128xf32>
    %1 = arith.truncf %0 : vector<24x128xf32> to vector<24x128xbf16>
    %c0_1 = arith.constant 0 : index
    %c0_2 = arith.constant 0 : index
    %2 = vector.load %arg2[%c0_1, %c0_2] : memref<128x256xbf16, #tpu.memory_space<vmem>>, vector<128x256xbf16>
    %cst = arith.constant dense<0.000000e+00> : vector<24x256xf32>
    %3 = tpu.matmul %1, %2, %cst {dimension_numbers = #tpu.dot_dimension_numbers<[1], [0], [0], [1], [0, 0, 1, 1], [], []>} : vector<24x128xbf16>, vector<128x256xbf16>, vector<24x256xf32> -> vector<24x256xf32>
    %c0_3 = arith.constant 0 : index
    %c0_4 = arith.constant 0 : index
    %4 = vector.load %arg3[%c0_3, %c0_4] : memref<1x256xf32, #tpu.memory_space<vmem>>, vector<1x256xf32>
    %5 = vector.broadcast %4 : vector<1x256xf32> to vector<24x256xf32>
    %6 = arith.addf %3, %5 : vector<24x256xf32>
    %cst_5 = arith.constant 0.000000e+00 : f32
    %7 = vector.broadcast %cst_5 : f32 to vector<24x256xf32>
    %8 = arith.maximumf %6, %7 : vector<24x256xf32>
    %9 = vector.extract_strided_slice %8 {offsets = [0, 0], sizes = [24, 128], strides = [1, 1]} : vector<24x256xf32> to vector<24x128xf32>
    %10 = vector.extract_strided_slice %8 {offsets = [0, 128], sizes = [24, 128], strides = [1, 1]} : vector<24x256xf32> to vector<24x128xf32>
    %11 = arith.subf %10, %0 : vector<24x128xf32>
    %12 = arith.mulf %9, %11 : vector<24x128xf32>
    %13 = arith.addf %12, %0 : vector<24x128xf32>
    %c0_6 = arith.constant 0 : index
    %c0_7 = arith.constant 0 : index
    %14 = vector.load %arg4[%c0_6, %c0_7] : memref<24x128xf32, #tpu.memory_space<vmem>>, vector<24x128xf32>
    tpu.vector_store %arg4[%c0_6, %c0_7], %13 {strides = array<i32>} : memref<24x128xf32, #tpu.memory_space<vmem>>, vector<24x128xf32>,
    return
  }
  func.func @transform_0(%arg0: i32) -> (i32, i32) {
    %c0_i32 = arith.constant 0 : i32
    %c0_i32_0 = arith.constant 0 : i32
    return %arg0, %c0_i32 : i32, i32
  }
  func.func @transform_1(%arg0: i32) -> (i32, i32) {
    %c0_i32 = arith.constant 0 : i32
    %c0_i32_0 = arith.constant 0 : i32
    %c0_i32_1 = arith.constant 0 : i32
    return %c0_i32, %c0_i32_0 : i32, i32
  }
  func.func @transform_2(%arg0: i32) -> (i32, i32) {
    %c0_i32 = arith.constant 0 : i32
    %c0_i32_0 = arith.constant 0 : i32
    %c0_i32_1 = arith.constant 0 : i32
    return %c0_i32, %c0_i32_0 : i32, i32
  }
  func.func @transform_3(%arg0: i32) -> (i32, i32) {
    %c0_i32 = arith.constant 0 : i32
    %c0_i32_0 = arith.constant 0 : i32
    return %arg0, %c0_i32 : i32, i32
  }
}

module attributes {stable_mosaic.version = 11 : i64} {
  func.func @highway_kernel(%arg0: i32, %arg1: memref<24x128xf32, #tpu.memory_space<vmem>>, %arg2: memref<128x256xbf16, #tpu.memory_space<vmem>>, %arg3: memref<1x256xf32, #tpu.memory_space<vmem>>, %arg4: memref<24x128xf32, #tpu.memory_space<vmem>>) attributes {dimension_semantics = [#tpu.dimension_semantics<parallel>], iteration_bounds = array<i64: 2>, scalar_prefetch = 0 : i64, scratch_operands = 0 : i64, tpu.core_type = #tpu.core_type<tc>, window_params = [{transform_indices = @transform_0, window_bounds = array<i64: 24, 128>}, {pipeline_mode = #tpu.pipeline_mode<synchronous>, transform_indices = @transform_1, window_bounds = array<i64: 128, 256>}, {pipeline_mode = #tpu.pipeline_mode<synchronous>, transform_indices = @transform_2, window_bounds = array<i64: 1, 256>}, {transform_indices = @transform_3, window_bounds = array<i64: 24, 128>}]} {
    %c0 = arith.constant 0 : index
    %c0_0 = arith.constant 0 : index
    %0 = vector.load %arg1[%c0, %c0_0] : memref<24x128xf32, #tpu.memory_space<vmem>>, vector<24x128xf32>
    %1 = arith.truncf %0 : vector<24x128xf32> to vector<24x128xbf16>
    %c0_1 = arith.constant 0 : index
    %c0_2 = arith.constant 0 : index
    %2 = vector.load %arg2[%c0_1, %c0_2] : memref<128x256xbf16, #tpu.memory_space<vmem>>, vector<128x256xbf16>
    %cst = arith.constant dense<0.000000e+00> : vector<24x256xf32>
    %3 = tpu.matmul %1, %2, %cst {dimension_numbers = #tpu.dot_dimension_numbers<[1], [0], [0], [1], [0, 0, 1, 1], [], []>} : vector<24x128xbf16>, vector<128x256xbf16>, vector<24x256xf32> -> vector<24x256xf32>
    %c0_3 = arith.constant 0 : index
    %c0_4 = arith.constant 0 : index
    %4 = vector.load %arg3[%c0_3, %c0_4] : memref<1x256xf32, #tpu.memory_space<vmem>>, vector<1x256xf32>
    %5 = vector.broadcast %4 : vector<1x256xf32> to vector<24x256xf32>
    %6 = arith.addf %3, %5 : vector<24x256xf32>
    %cst_5 = arith.constant 0.000000e+00 : f32
    %7 = vector.broadcast %cst_5 : f32 to vector<24x256xf32>
    %8 = arith.maximumf %6, %7 : vector<24x256xf32>
    %9 = vector.extract_strided_slice %8 {offsets = [0, 0], sizes = [24, 128], strides = [1, 1]} : vector<24x256xf32> to vector<24x128xf32>
    %10 = vector.extract_strided_slice %8 {offsets = [0, 128], sizes = [24, 128], strides = [1, 1]} : vector<24x256xf32> to vector<24x128xf32>
    %11 = arith.subf %10, %0 : vector<24x128xf32>
    %12 = arith.mulf %9, %11 : vector<24x128xf32>
    %13 = arith.addf %12, %0 : vector<24x128xf32>
    %c0_6 = arith.constant 0 : index
    %c0_7 = arith.constant 0 : index
    %14 = vector.load %arg4[%c0_6, %c0_7] : memref<24x128xf32, #tpu.memory_space<vmem>>, vector<24x128xf32>
    tpu.vector_store %arg4[%c0_6, %c0_7], %13 {strides = array<i32>} : memref<24x128xf32, #tpu.memory_space<vmem>>, vector<24x128xf32>,
    return
  }
  func.func @transform_0(%arg0: i32) -> (i32, i32) {
    %c0_i32 = arith.constant 0 : i32
    %c0_i32_0 = arith.constant 0 : i32
    return %arg0, %c0_i32 : i32, i32
  }
  func.func @transform_1(%arg0: i32) -> (i32, i32) {
    %c0_i32 = arith.constant 0 : i32
    %c0_i32_0 = arith.constant 0 : i32
    %c0_i32_1 = arith.constant 0 : i32
    return %c0_i32, %c0_i32_0 : i32, i32
  }
  func.func @transform_2(%arg0: i32) -> (i32, i32) {
    %c0_i32 = arith.constant 0 : i32
    %c0_i32_0 = arith.constant 0 : i32
    %c0_i32_1 = arith.constant 0 : i32
    return %c0_i32, %c0_i32_0 : i32, i32
  }
  func.func @transform_3(%arg0: i32) -> (i32, i32) {
    %c0_i32 = arith.constant 0 : i32
    %c0_i32_0 = arith.constant 0 : i32
    return %arg0, %c0_i32 : i32, i32
  }
}

</mosaic_0001>

<bundles_post_ra>
// kernel: tpu_custom_call.1
= control target key start
LH: loop header
LB: loop body
LE: loop exit
PB: predicated region body
PF: predicated region fallthrough
CT: control target
= control target key end

     0   :  { %8 = vsyncpa [#allocation3], 0  ;;  %s1129_s0 = inlined_call_operand.hbm [shape: f32[40,128], index: 0, kind: input, shape index: {}]   ;;  %s1130_s1 = inlined_call_operand.hbm [shape: bf16[128,256], index: 1, kind: input, shape index: {}]   ;;  %s1131_s2 = inlined_call_operand.hbm [shape: f32[1,256], index: 2, kind: input, shape index: {}]   ;;  %s1132_s3 = inlined_call_operand.hbm [shape: f32[40,128], index: 3, kind: output, shape index: {}]  }
   0x1   :  { %10 = vsyncpa [#allocation3 + $0x1], 0 }
   0x2   :  { %11 = vsyncpa [#allocation6], 0 }
   0x3   :  { %12 = vsyncpa [#allocation4], 0 }
   0x4   :  { %14 = vsyncpa [#allocation4 + $0x1], 0  ;;  %s913_s12 = smov 0   ;;  %s915_s13 = smov 0  }
   0x5   :  { %s917_s14 = smov 0   ;;  %s919_s15 = smov 0  }
   0x6 LB: > { %s934_s16 = sadd.s32 4294967295, %s881_s15   ;;  %s515_s17 = sadd.s32 4294967294, %s881_s15   ;;  %s881_s15 = sphi %s919_s15, %s1149_s15   ;;  %s877_s14 = sphi %s917_s14, %s1148_s14   ;;  %s873_s13 = sphi %s915_s13, %s1147_s13   ;;  %s869_s12 = sphi %s913_s12, %s1146_s12  }
   0x7   : > { %s938_s18 = sadd.s32 1, %s881_s15   ;;  %s27_s19 = sadd.s32 1, %s877_s14 }
   0x8   : > { %s24_s20 = ssub.s32 %s881_s15, %s938_s18  ;;  %p34_p0 = scmp.ne.s32.totalorder %s877_s14, %s873_s13 }
   0x9   : > { %p25_p1 = scmp.eq.s32.totalorder %s24_s20, 0  ;;  %p35_p2 = scmp.eq.s32.totalorder %s881_s15, 0 }
   0xa   : > { %p40_p3 = scmp.ne.s32.totalorder %s873_s13, %s869_s12  ;;  %p1134_p4 = scmp.eq.s32.totalorder %s934_s16, 0 }
   0xb   : > { %s950_s21 = scalar_select %p25_p1, %s877_s14, %s27_s19  }
   0xc   : > { %p952_p5 = por %p35_p2, %p34_p0  ;;  %p958_p6 = por %p1134_p4, %p40_p3 }
   0xd   : > { %p106_p7 = scmp.eq.s32.totalorder %s934_s16, 1  ;;  %p112_p8 = scmp.eq.s32.totalorder %s515_s17, 1 }
   0xe   : > { %p516_p9 = scmp.ge.s32.totalorder %s881_s15, 1  ;;  %p119_p10 = scmp.lt.s32.totalorder %s881_s15, 3 }
   0xf   : > { %p965_p11 = por %p106_p7, %p34_p0  ;;  %p969_p12 = por %p112_p8, %p40_p3 }
  0x10   : > { %p973_p13 = pnand %p516_p9, %p119_p10  ;;  %s130_s29 = sshll.u32 %s1130_s1, 4  ;;  %s131_s29 = int_to_ptr.hbm [resolvable:$true] %s130_s29 }
  0x11   : > { %s1138_s25 = scalar_select %p969_p12, 1, 0 }
  0x12   : > { %p645_p1 = pneg %p973_p13  ;;  %s883_s30 = smov [#allocation5]  }
  0x13   : > { %s132_s4 = sshll.u32 %s883_s30, 4  ;;  %s145_s7 = sshll.u32 %s1131_s2, 4  ;;  %s133_s4 = int_to_ptr.vmem [resolvable:$true] %s132_s4  ;;  %s146_s7 = int_to_ptr.hbm [resolvable:$true] %s145_s7 }
  0x14   : > { %p646_p0 = pnand %p645_p1, %p1134_p4  ;;  %s884_s8 = smov 128  }
  0x15   : > { %s885_s9 = smov 8   ;;  %s886_s10 = smov [#allocation7]  }
  0x16   : > { %648 = dma.hbm_to_vmem [thread:$0]  (!%p646_p0), %s131_s29, 2048, %s133_s4, [#allocation6], %s884_s8, %s884_s8, %s885_s9  }
  0x17   : > { %s147_s11 = sshll.u32 %s886_s10, 4  ;;  %p1133_p2 = scmp.ge.s32.totalorder %s881_s15, 2  ;;  %s148_s11 = int_to_ptr.vmem [resolvable:$true] %s147_s11 }
  0x18   : > { %651 = dma.hbm_to_vmem [thread:$0]  (!%p646_p0), %s146_s7, 32, %s148_s11, [#allocation6]  }
  0x19   : > { %154 = sbr.rel (%p1133_p2) target bundleno = 68 (0x44), region = 24 }
  0x1e   : > { %157 = sbr.rel (!%p952_p5) target bundleno = 68 (0x44), region = 28  ;;  %s158_s17 = sand.u32 (%p952_p5), 1, %s877_s14  }
  0x1f   : > { %s163_s19 = smul.u32 (%p952_p5), 3, %s881_s15  ;;  %s997_s4 = scalar_lea.sflag (%p952_p5), [#allocation3], %s158_s17 }
  0x20   : > { %s633_s20 = smul.u32 (%p952_p5), 24, %s158_s17 }
  0x21   : > { %s164_s27 = ssub.s32 (%p952_p5), 5, %s163_s19 }
  0x22   : > { %p165_p3 = scmp.lt.s32.totalorder (%p952_p5), %s164_s27, 3  ;;  %s162_s5 = scalar_lea.vmem (%p952_p5), [#allocation2], %s633_s20 }
  0x24   : > { %s1151_s27 = smov (!%p165_p3, %s164_s27), 3 }
  0x25   : > { %s520_s28 = sshll.u32 %s1151_s27, 3 }
  0x26   : > { %s168_s29 = ssub.s32 24, %s520_s28 }
  0x27   : > { %s169_s30 = sshll.u32 %s168_s29, 4 }
  0x28   : > { %170 = vsyncadd %s997_s4, %s169_s30  ;;  %p1000_p5 = scmp.ne.s32.totalorder %s520_s28, 0  ;;  %s599_s6 = smul.u32 24, %s881_s15 }
  0x29   : > { %s1005_s7 = sshll.u32 %s162_s5, 4  ;;  %s524_s8 = sshll.u32 %s1151_s27, 7  ;;  %s178_s7 = int_to_ptr.vmem [resolvable:$true] %s1005_s7 }
  0x2a   : > { %s173_s11 = scalar_lea.hbm %s1129_s0, %s599_s6  ;;  %s763_s20 = sshrl.u32 %s524_s8, 4 }
  0x2b   : > { %s175_s17 = sshll.u32 %s173_s11, 4  ;;  %s772_s5 = scalar_lea.hbm %s1129_s0, 40  ;;  %s1012_s17 = int_to_ptr.hbm [resolvable:$true] %s175_s17 }
  0x2c   : > { %s761_s19 = sshra.s32 %s1012_s17, 4  ;;  %s762_s19 = int_to_ptr.hbm [resolvable:$true] %s761_s19 }
  0x2d   : > { %s768_s28 = scalar_lea.hbm %s762_s19, %s763_s20  ;;  %p773_p10 = scmp.lt.s32.totalorder %s762_s19, %s1129_s0 }
  0x2e   : > { %p769_p7 = scmp.ne.s32.totalorder %s762_s19, %s768_s28  ;;  %p774_p1 = scmp.lt.s32.totalorder %s772_s5, %s768_s28 }
  0x30   : > { %p770_p8 = pnand %p769_p7, %p1000_p5  ;;  %p775_p0 = por %p774_p1, %p773_p10 }
  0x32   : > { %p771_p9 = pneg %p770_p8 }
  0x34   : > { %p776_p3 = pnand %p775_p0, %p771_p9 }
  0x36   : > { %779 = shalt.err (!%p776_p3)
}
  0x37   : > { %s780_s10 = sshra.s32 %s178_s7, 4  ;;  %s887_s29 = smov [#allocation2]   ;;  %s781_s10 = int_to_ptr.vmem [resolvable:$true] %s780_s10 }
  0x38   : > { %s787_s11 = scalar_lea.vmem %s781_s10, %s763_s20  ;;  %s791_s30 = scalar_lea.vmem %s887_s29, 48 }
  0x39   : > { %p788_p7 = scmp.ne.s32.totalorder %s781_s10, %s787_s11  ;;  %p793_p4 = scmp.lt.s32.totalorder %s791_s30, %s787_s11 }
  0x3b   : > { %p789_p8 = pnand %p788_p7, %p1000_p5 }
  0x3d   : > { %p790_p2 = pneg %p789_p8 }
  0x3f   : > { %p795_p12 = pnand %p793_p4, %p790_p2 }
  0x41   : > { %798 = shalt.err (!%p795_p12)
}
  0x42   : > { %s888_s19 = smov 128   ;;  %s889_s28 = smov 8  }
  0x43   : > { %183 = dma.hbm_to_vmem [thread:$0]  (%p1000_p5), %s1012_s17, %s524_s8, %s178_s7, %s997_s4, %s888_s19, %s888_s19, %s889_s28  }
  0x44 PF: > { %189 = sbr.rel (%p973_p13) target bundleno = 288 (0x120), region = 32  ;;  %s1040_s20 = sand.u32 (!%p973_p13), 1, %s873_s13  }
  0x45   : > { %s634_s5 = smul.u32 (!%p973_p13), 24, %s1040_s20  ;;  %s192_s9 = scalar_lea.sflag (!%p973_p13), [#allocation3], %s1040_s20 }
  0x47   : > { %s1046_s6 = scalar_lea.vmem (!%p973_p13), [#allocation2], %s634_s5 }
  0x49   : > { %856 = dma.done.wait (%p958_p6), %s192_s9, 384  }
  0x4a   : > { %858 = vsyncadd (%p958_p6), %s192_s9, 4294966912  ;;  %p1141_p4 = scmp.eq.s32.totalorder %s934_s16, 0 }
  0x4c   : > { %860 = dma.done.wait (%p1141_p4), [#allocation6], 2080   ;;  %p1142_p12 = pmov %p1141_p4 }
  0x4d   : > { %v586_v0 = vld [vmem:[#allocation5 + $0x70] sm:$0xf]  ;;  %v615_v1 = vld [vmem:[#allocation5 + $0x74] sm:$0xf0]  ;;  %v614_v2 = vld [vmem:[#allocation5 + $0x74] sm:$0xf] }
  0x4e   : > { %862 = vsyncadd (%p1142_p12), [#allocation6], 4294965216  ;;  %v587_v3 = vor.u32 %v615_v1, %v586_v0  ;;  %v588_v4 = vld [vmem:[#allocation5 + $0x78] sm:$0xf0]  ;;  %v578_v5 = vld [vmem:[#allocation5 + $0x60] sm:$0xf] }
  0x4f   : > { %v613_v6 = vld [vmem:[#allocation5 + $0x64] sm:$0xf0]  ;;  %v591_v7 = vor.u32 %v614_v2, %v588_v4  ;;  %v612_v8 = vld [vmem:[#allocation5 + $0x64] sm:$0xf]  ;;  %v580_v9 = vld [vmem:[#allocation5 + $0x68] sm:$0xf0] }
  0x50   : > { %346 = vmatpush.bf16.msra.mxu0 %v587_v3  ;;  %617 = vmatpush.bf16.msra.mxu2 %v587_v3  ;;  %v579_v10 = vor.u32 %v613_v6, %v578_v5  ;;  %v583_v11 = vor.u32 %v612_v8, %v580_v9  ;;  %v570_v12 = vld [vmem:[#allocation5 + $0x50] sm:$0xf]  ;;  %v611_v13 = vld [vmem:[#allocation5 + $0x54] sm:$0xf0]  ;;  %v610_v14 = vld [vmem:[#allocation5 + $0x54] sm:$0xf] }
  0x51   : > { %364 = vmatpush.bf16.msra.mxu1 %v591_v7  ;;  %625 = vmatpush.bf16.msra.mxu3 %v591_v7  ;;  %v572_v15 = vld [vmem:[#allocation5 + $0x58] sm:$0xf0]  ;;  %v571_v16 = vor.u32 %v611_v13, %v570_v12  ;;  %v562_v18 = vld [vmem:[#allocation5 + $0x40] sm:$0xf]  ;;  %v609_v19 = vld [vmem:[#allocation5 + $0x44] sm:$0xf0] }
  0x52   : > { %v575_v17 = vor.u32 %v610_v14, %v572_v15  ;;  %v608_v20 = vld [vmem:[#allocation5 + $0x44] sm:$0xf]  ;;  %v564_v21 = vld [vmem:[#allocation5 + $0x48] sm:$0xf0]  ;;  %v563_v22 = vor.u32 %v609_v19, %v562_v18  ;;  %v554_v24 = vld [vmem:[#allocation5 + $0x30] sm:$0xf] }
  0x53   : > { %v567_v23 = vor.u32 %v608_v20, %v564_v21  ;;  %v607_v25 = vld [vmem:[#allocation5 + $0x34] sm:$0xf0]  ;;  %v606_v26 = vld [vmem:[#allocation5 + $0x34] sm:$0xf]  ;;  %v556_v27 = vld [vmem:[#allocation5 + $0x38] sm:$0xf0] }
  0x54   : > { %347 = vmatpush.bf16.msra.mxu0 %v579_v10  ;;  %618 = vmatpush.bf16.msra.mxu2 %v579_v10  ;;  %v555_v28 = vor.u32 %v607_v25, %v554_v24  ;;  %v559_v29 = vor.u32 %v606_v26, %v556_v27  ;;  %v546_v30 = vld [vmem:[#allocation5 + $0x20] sm:$0xf]  ;;  %v605_v31 = vld [vmem:[#allocation5 + $0x24] sm:$0xf0]  ;;  %v604_v32 = vld [vmem:[#allocation5 + $0x24] sm:$0xf] }
  0x55   : > { %365 = vmatpush.bf16.msra.mxu1 %v583_v11  ;;  %626 = vmatpush.bf16.msra.mxu3 %v583_v11  ;;  %v548_v33 = vld [vmem:[#allocation5 + $0x28] sm:$0xf0]  ;;  %v547_v34 = vor.u32 %v605_v31, %v546_v30  ;;  %v538_v36 = vld [vmem:[#allocation5 + $0x10] sm:$0xf]  ;;  %v603_v37 = vld [vmem:[#allocation5 + $0x14] sm:$0xf0] }
  0x56   : > { %v551_v35 = vor.u32 %v604_v32, %v548_v33  ;;  %v602_v38 = vld [vmem:[#allocation5 + $0x14] sm:$0xf]  ;;  %v540_v39 = vld [vmem:[#allocation5 + $0x18] sm:$0xf0]  ;;  %v539_v40 = vor.u32 %v603_v37, %v538_v36  ;;  %v530_v42 = vld [vmem:[#allocation5] sm:$0xf] }
  0x57   : > { %v543_v41 = vor.u32 %v602_v38, %v540_v39  ;;  %v601_v43 = vld [vmem:[#allocation5 + $0x4] sm:$0xf0]  ;;  %v600_v44 = vld [vmem:[#allocation5 + $0x4] sm:$0xf]  ;;  %v532_v45 = vld [vmem:[#allocation5 + $0x8] sm:$0xf0] }
  0x58   : > { %348 = vmatpush.bf16.msra.mxu0 %v571_v16  ;;  %619 = vmatpush.bf16.msra.mxu2 %v571_v16  ;;  %v531_v46 = vor.u32 %v601_v43, %v530_v42  ;;  %v239_v47 = vld [vmem:[%s1046_s6] sm:$0xff]  ;;  %v240_v48 = vld [vmem:[%s1046_s6 + $0x8] sm:$0xff]  ;;  %v241_v49 = vld [vmem:[%s1046_s6 + $0x10] sm:$0xff]  ;;  %v535_v50 = vor.u32 %v600_v44, %v532_v45  ;;  %s1061_s23 = scalar_lea.vmem [#allocation8], %s634_s5  ;;  %s401_s26 = scalar_lea.sflag [#allocation4], %s1040_s20 }
  0x59   : > { %366 = vmatpush.bf16.msra.mxu1 %v575_v17  ;;  %627 = vmatpush.bf16.msra.mxu3 %v575_v17  ;;  %v242_v51 = vpack.c.bf16 %v240_v48, %v239_v47  ;;  %v243_v52 = vpack.c.bf16 %v241_v49, %v241_v49  ;;  %v260_v53 = vld [vmem:[#allocation7] sm:$0x3]  ;;  %s408_s27 = smul.u32 (%p965_p11), 3, %s934_s16 }
  0x5a   : > { %v262_v54 = vperm.slane %v260_v53, 0  ;;  %v263_v55 = vperm.slane %v260_v53, 1 }
  0x5b   : > { %s409_s4 = ssub.s32 (%p965_p11), 5, %s408_s27 }
  0x5c   : > { %349 = vmatpush.bf16.msra.mxu0 %v563_v22  ;;  %620 = vmatpush.bf16.msra.mxu2 %v563_v22  ;;  %p410_p6 = scmp.lt.s32.totalorder (%p965_p11), %s409_s4, 3 }
  0x5d   : > { %367 = vmatpush.bf16.msra.mxu1 %v567_v23  ;;  %628 = vmatpush.bf16.msra.mxu3 %v567_v23 }
  0x60   : > { %350 = vmatpush.bf16.msra.mxu0 %v555_v28  ;;  %621 = vmatpush.bf16.msra.mxu2 %v555_v28 }
  0x61   : > { %368 = vmatpush.bf16.msra.mxu1 %v559_v29  ;;  %629 = vmatpush.bf16.msra.mxu3 %v559_v29 }
  0x64   : > { %351 = vmatpush.bf16.msra.mxu0 %v547_v34  ;;  %622 = vmatpush.bf16.msra.mxu2 %v547_v34 }
  0x65   : > { %369 = vmatpush.bf16.msra.mxu1 %v551_v35  ;;  %630 = vmatpush.bf16.msra.mxu3 %v551_v35 }
  0x68   : > { %352 = vmatpush.bf16.msra.mxu0 %v539_v40  ;;  %623 = vmatpush.bf16.msra.mxu2 %v539_v40 }
  0x69   : > { %370 = vmatpush.bf16.msra.mxu1 %v543_v41  ;;  %631 = vmatpush.bf16.msra.mxu3 %v543_v41 }
  0x6c   : > { %353 = vmatpush.bf16.msra.mxu0 %v531_v46  ;;  %624 = vmatpush.bf16.msra.mxu2 %v531_v46 }
  0x6d   : > { %371 = vmatpush.bf16.msra.mxu1 %v535_v50  ;;  %632 = vmatpush.bf16.msra.mxu3 %v535_v50 }
  0x6f   : > { %354 = vmatmul.bf16.vlgmr.msra.gmra.mxu0 %v242_v51  ;;  %359 = vmatmul.bf16.vlgmr.msra.gmra.mxu2 %v243_v52 }
  0x70   : > { %372 = vmatmul.bf16.vlgmr.msra.gmra.mxu1 %v242_v51  ;;  %377 = vmatmul.bf16.vlgmr.msra.gmra.mxu3 %v243_v52 }
  0xec   : > { %v355_v56 = vpop.f32.mrf.mxu0 }
  0xed   : > { %v356_v57 = vadd.f32 %v355_v56, %v262_v54  ;;  %v373_v58 = vpop.f32.mrf.mxu1 }
  0xee   : > { %v374_v59 = vadd.f32 %v373_v58, %v263_v55 }
  0xef   : > { %v382_v60 = vmax.f32 %v356_v57, 0.0 }
  0xf0   : > { %v383_v61 = vmax.f32 %v374_v59, 0.0 }
  0xf2   : > { %v388_v62 = vsub.f32 %v383_v61, %v239_v47  ;;  %v360_v63 = vpop.f32.mrf.mxu2 }
  0xf3   : > { %v361_v0 = vadd.f32 %v360_v63, %v262_v54  ;;  %v378_v1 = vpop.f32.mrf.mxu3 }
  0xf4   : > { %v391_v2 = vmul.f32 %v388_v62, %v382_v60  ;;  %v379_v3 = vadd.f32 %v378_v1, %v263_v55  ;;  %v357_v4 = vpop.f32.mrf.mxu0 }
  0xf5   : > { %v386_v5 = vmax.f32 %v361_v0, 0.0  ;;  %v375_v6 = vpop.f32.mrf.mxu1  ;;  %v358_v9 = vadd.f32 %v357_v4, %v262_v54 }
  0xf6   : > { %v394_v7 = vadd.f32 %v391_v2, %v239_v47  ;;  %v387_v8 = vmax.f32 %v379_v3, 0.0  ;;  %v376_v10 = vadd.f32 %v375_v6, %v263_v55 }
  0xf7   : > { %v384_v14 = vmax.f32 %v358_v9, 0.0 }
  0xf8   : > { %397 = vst [vmem:[%s1061_s23] sm:$0xff] %v394_v7  ;;  %v390_v11 = vsub.f32 %v387_v8, %v241_v49  ;;  %v385_v12 = vmax.f32 %v376_v10, 0.0 }
  0xfa   : > { %v393_v13 = vmul.f32 %v390_v11, %v386_v5  ;;  %v389_v15 = vsub.f32 %v385_v12, %v240_v48  ;;  %v362_v16 = vpop.f32.mrf.mxu2 }
  0xfb   : > { %v380_v17 = vpop.f32.mrf.mxu3 }
  0xfc   : > { %v396_v18 = vadd.f32 %v393_v13, %v241_v49  ;;  %v392_v19 = vmul.f32 %v389_v15, %v384_v14  ;;  %407 = sbr.rel (!%p965_p11) target bundleno = 288 (0x120), region = 48 }
  0xfe   : > { %399 = vst [vmem:[%s1061_s23 + $0x10] sm:$0xff] %v396_v18  ;;  %v395_v20 = vadd.f32 %v392_v19, %v240_v48 }
 0x100   : > { %398 = vst [vmem:[%s1061_s23 + $0x8] sm:$0xff] %v395_v20 }
 0x101   : > { %s1153_s4 = smov (!%p410_p6, %s409_s4), 3 }
 0x102   : > { %s592_s22 = sshll.u32 %s1153_s4, 3 }
 0x103   : > { %s413_s7 = ssub.s32 24, %s592_s22 }
 0x104   : > { %s414_s8 = sshll.u32 %s413_s7, 4 }
 0x105   : > { %415 = vsyncadd %s401_s26, %s414_s8  ;;  %p1075_p13 = scmp.ne.s32.totalorder %s592_s22, 0  ;;  %s616_s17 = smul.u32 24, %s934_s16 }
 0x106   : > { %s420_s10 = sshll.u32 %s1061_s23, 4  ;;  %s596_s11 = sshll.u32 %s1153_s4, 7  ;;  %s1085_s10 = int_to_ptr.vmem [resolvable:$true] %s420_s10 }
 0x107   : > { %s418_s19 = scalar_lea.hbm %s1132_s3, %s616_s17  ;;  %s800_s5 = sshra.s32 %s1085_s10, 4  ;;  %s801_s5 = int_to_ptr.vmem [resolvable:$true] %s800_s5 }
 0x108   : > { %s422_s28 = sshll.u32 %s418_s19, 4  ;;  %s802_s9 = sshrl.u32 %s596_s11, 4  ;;  %s1087_s28 = int_to_ptr.hbm [resolvable:$true] %s422_s28 }
 0x109   : > { %s807_s6 = scalar_lea.vmem %s801_s5, %s802_s9  ;;  %s890_s16 = smov [#allocation8]  }
 0x10a   : > { %p808_p11 = scmp.ne.s32.totalorder %s801_s5, %s807_s6  ;;  %s811_s23 = scalar_lea.vmem %s890_s16, 48 }
 0x10b   : > { %p813_p9 = scmp.lt.s32.totalorder %s811_s23, %s807_s6 }
 0x10c   : > { %p809_p2 = pnand %p808_p11, %p1075_p13 }
 0x10e   : > { %p810_p5 = pneg %p809_p2 }
 0x110   : > { %p815_p10 = pnand %p813_p9, %p810_p5 }
 0x112   : > { %818 = shalt.err (!%p815_p10)
}
 0x113   : > { %s819_s27 = sshra.s32 %s1087_s28, 4  ;;  %s830_s17 = scalar_lea.hbm %s1132_s3, 40  ;;  %s820_s27 = int_to_ptr.hbm [resolvable:$true] %s819_s27 }
 0x114   : > { %s826_s22 = scalar_lea.hbm %s820_s27, %s802_s9  ;;  %p831_p7 = scmp.lt.s32.totalorder %s820_s27, %s1132_s3 }
 0x115   : > { %p827_p1 = scmp.ne.s32.totalorder %s820_s27, %s826_s22  ;;  %p832_p8 = scmp.lt.s32.totalorder %s830_s17, %s826_s22 }
 0x117   : > { %p828_p0 = pnand %p827_p1, %p1075_p13  ;;  %p833_p4 = por %p832_p8, %p831_p7 }
 0x119   : > { %p829_p3 = pneg %p828_p0 }
 0x11b   : > { %p834_p12 = pnand %p833_p4, %p829_p3 }
 0x11d   : > { %837 = shalt.err (!%p834_p12)
}
 0x11e   : > { %s891_s19 = smov 128   ;;  %s892_s5 = smov 8  }
 0x11f   : > { %428 = dma.vmem_to_hbm [thread:$0]  (%p1075_p13), %s1085_s10, %s596_s11, %s1087_s28, %s401_s26, %s891_s19, %s891_s19, %s892_s5  }
 0x120 PF: > { %s437_s9 = sand.u32 1, %s869_s12   ;;  %p1144_p6 = scmp.ne.s32.totalorder %s1138_s25, 0 }
 0x121   : > { %p1145_p11 = scmp.ge.s32.totalorder %s881_s15, 2  ;;  %s438_s6 = scalar_lea.sflag [#allocation4], %s437_s9 }
 0x123   : > { %p653_p2 = pnand %p1145_p11, %p1144_p6 }
 0x125   : > { %p654_p5 = pneg %p653_p2 }
 0x127   : > { %864 = dma.done.wait (%p654_p5), %s438_s6, 384  }
 0x128   : > { %866 = vsyncadd (%p654_p5), %s438_s6, 4294966912  ;;  %p17_p9 = scmp.ge.s32.totalorder %s938_s18, 4   ;;  %s1146_s12 = smov %s873_s13 }
 0x129   : > { %s1147_s13 = smov %s877_s14  ;;  %s1148_s14 = smov %s950_s21 }
 0x12a   : > { %s1149_s15 = smov %s938_s18  ;;  %19 = sbr.rel (!%p17_p9) target bundleno = 6 (0x6), region = 85 }
 0x12f   :  { %444 = vsyncpa [#allocation3], 1 }
 0x130   :  { %446 = vsyncpa [#allocation3 + $0x1], 1 }
 0x131   :  { %447 = vsyncpa [#allocation6], 1 }
 0x132   :  { %448 = vsyncpa [#allocation4], 1 }
 0x133   :  { %450 = vsyncpa [#allocation4 + $0x1], 1 }

// kernel: tpu_custom_call.1
= control target key start
LH: loop header
LB: loop body
LE: loop exit
PB: predicated region body
PF: predicated region fallthrough
CT: control target
= control target key end

     0   :  { %8 = vsyncpa [#allocation3], 0  ;;  %s1129_s0 = inlined_call_operand.hbm [shape: f32[40,128], index: 0, kind: input, shape index: {}]   ;;  %s1130_s1 = inlined_call_operand.hbm [shape: bf16[128,256], index: 1, kind: input, shape index: {}]   ;;  %s1131_s2 = inlined_call_operand.hbm [shape: f32[1,256], index: 2, kind: input, shape index: {}]   ;;  %s1132_s3 = inlined_call_operand.hbm [shape: f32[40,128], index: 3, kind: output, shape index: {}]  }
   0x1   :  { %10 = vsyncpa [#allocation3 + $0x1], 0 }
   0x2   :  { %11 = vsyncpa [#allocation6], 0 }
   0x3   :  { %12 = vsyncpa [#allocation4], 0 }
   0x4   :  { %14 = vsyncpa [#allocation4 + $0x1], 0  ;;  %s913_s12 = smov 0   ;;  %s915_s13 = smov 0  }
   0x5   :  { %s917_s14 = smov 0   ;;  %s919_s15 = smov 0  }
   0x6 LB: > { %s934_s16 = sadd.s32 4294967295, %s881_s15   ;;  %s515_s17 = sadd.s32 4294967294, %s881_s15   ;;  %s881_s15 = sphi %s919_s15, %s1149_s15   ;;  %s877_s14 = sphi %s917_s14, %s1148_s14   ;;  %s873_s13 = sphi %s915_s13, %s1147_s13   ;;  %s869_s12 = sphi %s913_s12, %s1146_s12  }
   0x7   : > { %s938_s18 = sadd.s32 1, %s881_s15   ;;  %s27_s19 = sadd.s32 1, %s877_s14 }
   0x8   : > { %s24_s20 = ssub.s32 %s881_s15, %s938_s18  ;;  %p34_p0 = scmp.ne.s32.totalorder %s877_s14, %s873_s13 }
   0x9   : > { %p25_p1 = scmp.eq.s32.totalorder %s24_s20, 0  ;;  %p35_p2 = scmp.eq.s32.totalorder %s881_s15, 0 }
   0xa   : > { %p40_p3 = scmp.ne.s32.totalorder %s873_s13, %s869_s12  ;;  %p1134_p4 = scmp.eq.s32.totalorder %s934_s16, 0 }
   0xb   : > { %s950_s21 = scalar_select %p25_p1, %s877_s14, %s27_s19  }
   0xc   : > { %p952_p5 = por %p35_p2, %p34_p0  ;;  %p958_p6 = por %p1134_p4, %p40_p3 }
   0xd   : > { %p106_p7 = scmp.eq.s32.totalorder %s934_s16, 1  ;;  %p112_p8 = scmp.eq.s32.totalorder %s515_s17, 1 }
   0xe   : > { %p516_p9 = scmp.ge.s32.totalorder %s881_s15, 1  ;;  %p119_p10 = scmp.lt.s32.totalorder %s881_s15, 3 }
   0xf   : > { %p965_p11 = por %p106_p7, %p34_p0  ;;  %p969_p12 = por %p112_p8, %p40_p3 }
  0x10   : > { %p973_p13 = pnand %p516_p9, %p119_p10  ;;  %s130_s29 = sshll.u32 %s1130_s1, 4  ;;  %s131_s29 = int_to_ptr.hbm [resolvable:$true] %s130_s29 }
  0x11   : > { %s1138_s25 = scalar_select %p969_p12, 1, 0 }
  0x12   : > { %p645_p1 = pneg %p973_p13  ;;  %s883_s30 = smov [#allocation5]  }
  0x13   : > { %s132_s4 = sshll.u32 %s883_s30, 4  ;;  %s145_s7 = sshll.u32 %s1131_s2, 4  ;;  %s133_s4 = int_to_ptr.vmem [resolvable:$true] %s132_s4  ;;  %s146_s7 = int_to_ptr.hbm [resolvable:$true] %s145_s7 }
  0x14   : > { %p646_p0 = pnand %p645_p1, %p1134_p4  ;;  %s884_s8 = smov 128  }
  0x15   : > { %s885_s9 = smov 8   ;;  %s886_s10 = smov [#allocation7]  }
  0x16   : > { %648 = dma.hbm_to_vmem [thread:$0]  (!%p646_p0), %s131_s29, 2048, %s133_s4, [#allocation6], %s884_s8, %s884_s8, %s885_s9  }
  0x17   : > { %s147_s11 = sshll.u32 %s886_s10, 4  ;;  %p1133_p2 = scmp.ge.s32.totalorder %s881_s15, 2  ;;  %s148_s11 = int_to_ptr.vmem [resolvable:$true] %s147_s11 }
  0x18   : > { %651 = dma.hbm_to_vmem [thread:$0]  (!%p646_p0), %s146_s7, 32, %s148_s11, [#allocation6]  }
  0x19   : > { %154 = sbr.rel (%p1133_p2) target bundleno = 68 (0x44), region = 24 }
  0x1e   : > { %157 = sbr.rel (!%p952_p5) target bundleno = 68 (0x44), region = 28  ;;  %s158_s17 = sand.u32 (%p952_p5), 1, %s877_s14  }
  0x1f   : > { %s163_s19 = smul.u32 (%p952_p5), 3, %s881_s15  ;;  %s997_s4 = scalar_lea.sflag (%p952_p5), [#allocation3], %s158_s17 }
  0x20   : > { %s633_s20 = smul.u32 (%p952_p5), 24, %s158_s17 }
  0x21   : > { %s164_s27 = ssub.s32 (%p952_p5), 5, %s163_s19 }
  0x22   : > { %p165_p3 = scmp.lt.s32.totalorder (%p952_p5), %s164_s27, 3  ;;  %s162_s5 = scalar_lea.vmem (%p952_p5), [#allocation2], %s633_s20 }
  0x24   : > { %s1151_s27 = smov (!%p165_p3, %s164_s27), 3 }
  0x25   : > { %s520_s28 = sshll.u32 %s1151_s27, 3 }
  0x26   : > { %s168_s29 = ssub.s32 24, %s520_s28 }
  0x27   : > { %s169_s30 = sshll.u32 %s168_s29, 4 }
  0x28   : > { %170 = vsyncadd %s997_s4, %s169_s30  ;;  %p1000_p5 = scmp.ne.s32.totalorder %s520_s28, 0  ;;  %s599_s6 = smul.u32 24, %s881_s15 }
  0x29   : > { %s1005_s7 = sshll.u32 %s162_s5, 4  ;;  %s524_s8 = sshll.u32 %s1151_s27, 7  ;;  %s178_s7 = int_to_ptr.vmem [resolvable:$true] %s1005_s7 }
  0x2a   : > { %s173_s11 = scalar_lea.hbm %s1129_s0, %s599_s6  ;;  %s763_s20 = sshrl.u32 %s524_s8, 4 }
  0x2b   : > { %s175_s17 = sshll.u32 %s173_s11, 4  ;;  %s772_s5 = scalar_lea.hbm %s1129_s0, 40  ;;  %s1012_s17 = int_to_ptr.hbm [resolvable:$true] %s175_s17 }
  0x2c   : > { %s761_s19 = sshra.s32 %s1012_s17, 4  ;;  %s762_s19 = int_to_ptr.hbm [resolvable:$true] %s761_s19 }
  0x2d   : > { %s768_s28 = scalar_lea.hbm %s762_s19, %s763_s20  ;;  %p773_p10 = scmp.lt.s32.totalorder %s762_s19, %s1129_s0 }
  0x2e   : > { %p769_p7 = scmp.ne.s32.totalorder %s762_s19, %s768_s28  ;;  %p774_p1 = scmp.lt.s32.totalorder %s772_s5, %s768_s28 }
  0x30   : > { %p770_p8 = pnand %p769_p7, %p1000_p5  ;;  %p775_p0 = por %p774_p1, %p773_p10 }
  0x32   : > { %p771_p9 = pneg %p770_p8 }
  0x34   : > { %p776_p3 = pnand %p775_p0, %p771_p9 }
  0x36   : > { %779 = shalt.err (!%p776_p3)
}
  0x37   : > { %s780_s10 = sshra.s32 %s178_s7, 4  ;;  %s887_s29 = smov [#allocation2]   ;;  %s781_s10 = int_to_ptr.vmem [resolvable:$true] %s780_s10 }
  0x38   : > { %s787_s11 = scalar_lea.vmem %s781_s10, %s763_s20  ;;  %s791_s30 = scalar_lea.vmem %s887_s29, 48 }
  0x39   : > { %p788_p7 = scmp.ne.s32.totalorder %s781_s10, %s787_s11  ;;  %p793_p4 = scmp.lt.s32.totalorder %s791_s30, %s787_s11 }
  0x3b   : > { %p789_p8 = pnand %p788_p7, %p1000_p5 }
  0x3d   : > { %p790_p2 = pneg %p789_p8 }
  0x3f   : > { %p795_p12 = pnand %p793_p4, %p790_p2 }
  0x41   : > { %798 = shalt.err (!%p795_p12)
}
  0x42   : > { %s888_s19 = smov 128   ;;  %s889_s28 = smov 8  }
  0x43   : > { %183 = dma.hbm_to_vmem [thread:$0]  (%p1000_p5), %s1012_s17, %s524_s8, %s178_s7, %s997_s4, %s888_s19, %s888_s19, %s889_s28  }
  0x44 PF: > { %189 = sbr.rel (%p973_p13) target bundleno = 288 (0x120), region = 32  ;;  %s1040_s20 = sand.u32 (!%p973_p13), 1, %s873_s13  }
  0x45   : > { %s634_s5 = smul.u32 (!%p973_p13), 24, %s1040_s20  ;;  %s192_s9 = scalar_lea.sflag (!%p973_p13), [#allocation3], %s1040_s20 }
  0x47   : > { %s1046_s6 = scalar_lea.vmem (!%p973_p13), [#allocation2], %s634_s5 }
  0x49   : > { %856 = dma.done.wait (%p958_p6), %s192_s9, 384  }
  0x4a   : > { %858 = vsyncadd (%p958_p6), %s192_s9, 4294966912  ;;  %p1141_p4 = scmp.eq.s32.totalorder %s934_s16, 0 }
  0x4c   : > { %860 = dma.done.wait (%p1141_p4), [#allocation6], 2080   ;;  %p1142_p12 = pmov %p1141_p4 }
  0x4d   : > { %v586_v0 = vld [vmem:[#allocation5 + $0x70] sm:$0xf]  ;;  %v615_v1 = vld [vmem:[#allocation5 + $0x74] sm:$0xf0]  ;;  %v614_v2 = vld [vmem:[#allocation5 + $0x74] sm:$0xf] }
  0x4e   : > { %862 = vsyncadd (%p1142_p12), [#allocation6], 4294965216  ;;  %v587_v3 = vor.u32 %v615_v1, %v586_v0  ;;  %v588_v4 = vld [vmem:[#allocation5 + $0x78] sm:$0xf0]  ;;  %v578_v5 = vld [vmem:[#allocation5 + $0x60] sm:$0xf] }
  0x4f   : > { %v613_v6 = vld [vmem:[#allocation5 + $0x64] sm:$0xf0]  ;;  %v591_v7 = vor.u32 %v614_v2, %v588_v4  ;;  %v612_v8 = vld [vmem:[#allocation5 + $0x64] sm:$0xf]  ;;  %v580_v9 = vld [vmem:[#allocation5 + $0x68] sm:$0xf0] }
  0x50   : > { %346 = vmatpush.bf16.msra.mxu0 %v587_v3  ;;  %617 = vmatpush.bf16.msra.mxu2 %v587_v3  ;;  %v579_v10 = vor.u32 %v613_v6, %v578_v5  ;;  %v583_v11 = vor.u32 %v612_v8, %v580_v9  ;;  %v570_v12 = vld [vmem:[#allocation5 + $0x50] sm:$0xf]  ;;  %v611_v13 = vld [vmem:[#allocation5 + $0x54] sm:$0xf0]  ;;  %v610_v14 = vld [vmem:[#allocation5 + $0x54] sm:$0xf] }
  0x51   : > { %364 = vmatpush.bf16.msra.mxu1 %v591_v7  ;;  %625 = vmatpush.bf16.msra.mxu3 %v591_v7  ;;  %v572_v15 = vld [vmem:[#allocation5 + $0x58] sm:$0xf0]  ;;  %v571_v16 = vor.u32 %v611_v13, %v570_v12  ;;  %v562_v18 = vld [vmem:[#allocation5 + $0x40] sm:$0xf]  ;;  %v609_v19 = vld [vmem:[#allocation5 + $0x44] sm:$0xf0] }
  0x52   : > { %v575_v17 = vor.u32 %v610_v14, %v572_v15  ;;  %v608_v20 = vld [vmem:[#allocation5 + $0x44] sm:$0xf]  ;;  %v564_v21 = vld [vmem:[#allocation5 + $0x48] sm:$0xf0]  ;;  %v563_v22 = vor.u32 %v609_v19, %v562_v18  ;;  %v554_v24 = vld [vmem:[#allocation5 + $0x30] sm:$0xf] }
  0x53   : > { %v567_v23 = vor.u32 %v608_v20, %v564_v21  ;;  %v607_v25 = vld [vmem:[#allocation5 + $0x34] sm:$0xf0]  ;;  %v606_v26 = vld [vmem:[#allocation5 + $0x34] sm:$0xf]  ;;  %v556_v27 = vld [vmem:[#allocation5 + $0x38] sm:$0xf0] }
  0x54   : > { %347 = vmatpush.bf16.msra.mxu0 %v579_v10  ;;  %618 = vmatpush.bf16.msra.mxu2 %v579_v10  ;;  %v555_v28 = vor.u32 %v607_v25, %v554_v24  ;;  %v559_v29 = vor.u32 %v606_v26, %v556_v27  ;;  %v546_v30 = vld [vmem:[#allocation5 + $0x20] sm:$0xf]  ;;  %v605_v31 = vld [vmem:[#allocation5 + $0x24] sm:$0xf0]  ;;  %v604_v32 = vld [vmem:[#allocation5 + $0x24] sm:$0xf] }
  0x55   : > { %365 = vmatpush.bf16.msra.mxu1 %v583_v11  ;;  %626 = vmatpush.bf16.msra.mxu3 %v583_v11  ;;  %v548_v33 = vld [vmem:[#allocation5 + $0x28] sm:$0xf0]  ;;  %v547_v34 = vor.u32 %v605_v31, %v546_v30  ;;  %v538_v36 = vld [vmem:[#allocation5 + $0x10] sm:$0xf]  ;;  %v603_v37 = vld [vmem:[#allocation5 + $0x14] sm:$0xf0] }
  0x56   : > { %v551_v35 = vor.u32 %v604_v32, %v548_v33  ;;  %v602_v38 = vld [vmem:[#allocation5 + $0x14] sm:$0xf]  ;;  %v540_v39 = vld [vmem:[#allocation5 + $0x18] sm:$0xf0]  ;;  %v539_v40 = vor.u32 %v603_v37, %v538_v36  ;;  %v530_v42 = vld [vmem:[#allocation5] sm:$0xf] }
  0x57   : > { %v543_v41 = vor.u32 %v602_v38, %v540_v39  ;;  %v601_v43 = vld [vmem:[#allocation5 + $0x4] sm:$0xf0]  ;;  %v600_v44 = vld [vmem:[#allocation5 + $0x4] sm:$0xf]  ;;  %v532_v45 = vld [vmem:[#allocation5 + $0x8] sm:$0xf0] }
  0x58   : > { %348 = vmatpush.bf16.msra.mxu0 %v571_v16  ;;  %619 = vmatpush.bf16.msra.mxu2 %v571_v16  ;;  %v531_v46 = vor.u32 %v601_v43, %v530_v42  ;;  %v239_v47 = vld [vmem:[%s1046_s6] sm:$0xff]  ;;  %v240_v48 = vld [vmem:[%s1046_s6 + $0x8] sm:$0xff]  ;;  %v241_v49 = vld [vmem:[%s1046_s6 + $0x10] sm:$0xff]  ;;  %v535_v50 = vor.u32 %v600_v44, %v532_v45  ;;  %s1061_s23 = scalar_lea.vmem [#allocation8], %s634_s5  ;;  %s401_s26 = scalar_lea.sflag [#allocation4], %s1040_s20 }
  0x59   : > { %366 = vmatpush.bf16.msra.mxu1 %v575_v17  ;;  %627 = vmatpush.bf16.msra.mxu3 %v575_v17  ;;  %v242_v51 = vpack.c.bf16 %v240_v48, %v239_v47  ;;  %v243_v52 = vpack.c.bf16 %v241_v49, %v241_v49  ;;  %v260_v53 = vld [vmem:[#allocation7] sm:$0x3]  ;;  %s408_s27 = smul.u32 (%p965_p11), 3, %s934_s16 }
  0x5a   : > { %v262_v54 = vperm.slane %v260_v53, 0  ;;  %v263_v55 = vperm.slane %v260_v53, 1 }
  0x5b   : > { %s409_s4 = ssub.s32 (%p965_p11), 5, %s408_s27 }
  0x5c   : > { %349 = vmatpush.bf16.msra.mxu0 %v563_v22  ;;  %620 = vmatpush.bf16.msra.mxu2 %v563_v22  ;;  %p410_p6 = scmp.lt.s32.totalorder (%p965_p11), %s409_s4, 3 }
  0x5d   : > { %367 = vmatpush.bf16.msra.mxu1 %v567_v23  ;;  %628 = vmatpush.bf16.msra.mxu3 %v567_v23 }
  0x60   : > { %350 = vmatpush.bf16.msra.mxu0 %v555_v28  ;;  %621 = vmatpush.bf16.msra.mxu2 %v555_v28 }
  0x61   : > { %368 = vmatpush.bf16.msra.mxu1 %v559_v29  ;;  %629 = vmatpush.bf16.msra.mxu3 %v559_v29 }
  0x64   : > { %351 = vmatpush.bf16.msra.mxu0 %v547_v34  ;;  %622 = vmatpush.bf16.msra.mxu2 %v547_v34 }
  0x65   : > { %369 = vmatpush.bf16.msra.mxu1 %v551_v35  ;;  %630 = vmatpush.bf16.msra.mxu3 %v551_v35 }
  0x68   : > { %352 = vmatpush.bf16.msra.mxu0 %v539_v40  ;;  %623 = vmatpush.bf16.msra.mxu2 %v539_v40 }
  0x69   : > { %370 = vmatpush.bf16.msra.mxu1 %v543_v41  ;;  %631 = vmatpush.bf16.msra.mxu3 %v543_v41 }
  0x6c   : > { %353 = vmatpush.bf16.msra.mxu0 %v531_v46  ;;  %624 = vmatpush.bf16.msra.mxu2 %v531_v46 }
  0x6d   : > { %371 = vmatpush.bf16.msra.mxu1 %v535_v50  ;;  %632 = vmatpush.bf16.msra.mxu3 %v535_v50 }
  0x6f   : > { %354 = vmatmul.bf16.vlgmr.msra.gmra.mxu0 %v242_v51  ;;  %359 = vmatmul.bf16.vlgmr.msra.gmra.mxu2 %v243_v52 }
  0x70   : > { %372 = vmatmul.bf16.vlgmr.msra.gmra.mxu1 %v242_v51  ;;  %377 = vmatmul.bf16.vlgmr.msra.gmra.mxu3 %v243_v52 }
  0xec   : > { %v355_v56 = vpop.f32.mrf.mxu0 }
  0xed   : > { %v356_v57 = vadd.f32 %v355_v56, %v262_v54  ;;  %v373_v58 = vpop.f32.mrf.mxu1 }
  0xee   : > { %v374_v59 = vadd.f32 %v373_v58, %v263_v55 }
  0xef   : > { %v382_v60 = vmax.f32 %v356_v57, 0.0 }
  0xf0   : > { %v383_v61 = vmax.f32 %v374_v59, 0.0 }
  0xf2   : > { %v388_v62 = vsub.f32 %v383_v61, %v239_v47  ;;  %v360_v63 = vpop.f32.mrf.mxu2 }
  0xf3   : > { %v361_v0 = vadd.f32 %v360_v63, %v262_v54  ;;  %v378_v1 = vpop.f32.mrf.mxu3 }
  0xf4   : > { %v391_v2 = vmul.f32 %v388_v62, %v382_v60  ;;  %v379_v3 = vadd.f32 %v378_v1, %v263_v55  ;;  %v357_v4 = vpop.f32.mrf.mxu0 }
  0xf5   : > { %v386_v5 = vmax.f32 %v361_v0, 0.0  ;;  %v375_v6 = vpop.f32.mrf.mxu1  ;;  %v358_v9 = vadd.f32 %v357_v4, %v262_v54 }
  0xf6   : > { %v394_v7 = vadd.f32 %v391_v2, %v239_v47  ;;  %v387_v8 = vmax.f32 %v379_v3, 0.0  ;;  %v376_v10 = vadd.f32 %v375_v6, %v263_v55 }
  0xf7   : > { %v384_v14 = vmax.f32 %v358_v9, 0.0 }
  0xf8   : > { %397 = vst [vmem:[%s1061_s23] sm:$0xff] %v394_v7  ;;  %v390_v11 = vsub.f32 %v387_v8, %v241_v49  ;;  %v385_v12 = vmax.f32 %v376_v10, 0.0 }
  0xfa   : > { %v393_v13 = vmul.f32 %v390_v11, %v386_v5  ;;  %v389_v15 = vsub.f32 %v385_v12, %v240_v48  ;;  %v362_v16 = vpop.f32.mrf.mxu2 }
  0xfb   : > { %v380_v17 = vpop.f32.mrf.mxu3 }
  0xfc   : > { %v396_v18 = vadd.f32 %v393_v13, %v241_v49  ;;  %v392_v19 = vmul.f32 %v389_v15, %v384_v14  ;;  %407 = sbr.rel (!%p965_p11) target bundleno = 288 (0x120), region = 48 }
  0xfe   : > { %399 = vst [vmem:[%s1061_s23 + $0x10] sm:$0xff] %v396_v18  ;;  %v395_v20 = vadd.f32 %v392_v19, %v240_v48 }
 0x100   : > { %398 = vst [vmem:[%s1061_s23 + $0x8] sm:$0xff] %v395_v20 }
 0x101   : > { %s1153_s4 = smov (!%p410_p6, %s409_s4), 3 }
 0x102   : > { %s592_s22 = sshll.u32 %s1153_s4, 3 }
 0x103   : > { %s413_s7 = ssub.s32 24, %s592_s22 }
 0x104   : > { %s414_s8 = sshll.u32 %s413_s7, 4 }
 0x105   : > { %415 = vsyncadd %s401_s26, %s414_s8  ;;  %p1075_p13 = scmp.ne.s32.totalorder %s592_s22, 0  ;;  %s616_s17 = smul.u32 24, %s934_s16 }
 0x106   : > { %s420_s10 = sshll.u32 %s1061_s23, 4  ;;  %s596_s11 = sshll.u32 %s1153_s4, 7  ;;  %s1085_s10 = int_to_ptr.vmem [resolvable:$true] %s420_s10 }
 0x107   : > { %s418_s19 = scalar_lea.hbm %s1132_s3, %s616_s17  ;;  %s800_s5 = sshra.s32 %s1085_s10, 4  ;;  %s801_s5 = int_to_ptr.vmem [resolvable:$true] %s800_s5 }
 0x108   : > { %s422_s28 = sshll.u32 %s418_s19, 4  ;;  %s802_s9 = sshrl.u32 %s596_s11, 4  ;;  %s1087_s28 = int_to_ptr.hbm [resolvable:$true] %s422_s28 }
 0x109   : > { %s807_s6 = scalar_lea.vmem %s801_s5, %s802_s9  ;;  %s890_s16 = smov [#allocation8]  }
 0x10a   : > { %p808_p11 = scmp.ne.s32.totalorder %s801_s5, %s807_s6  ;;  %s811_s23 = scalar_lea.vmem %s890_s16, 48 }
 0x10b   : > { %p813_p9 = scmp.lt.s32.totalorder %s811_s23, %s807_s6 }
 0x10c   : > { %p809_p2 = pnand %p808_p11, %p1075_p13 }
 0x10e   : > { %p810_p5 = pneg %p809_p2 }
 0x110   : > { %p815_p10 = pnand %p813_p9, %p810_p5 }
 0x112   : > { %818 = shalt.err (!%p815_p10)
}
 0x113   : > { %s819_s27 = sshra.s32 %s1087_s28, 4  ;;  %s830_s17 = scalar_lea.hbm %s1132_s3, 40  ;;  %s820_s27 = int_to_ptr.hbm [resolvable:$true] %s819_s27 }
 0x114   : > { %s826_s22 = scalar_lea.hbm %s820_s27, %s802_s9  ;;  %p831_p7 = scmp.lt.s32.totalorder %s820_s27, %s1132_s3 }
 0x115   : > { %p827_p1 = scmp.ne.s32.totalorder %s820_s27, %s826_s22  ;;  %p832_p8 = scmp.lt.s32.totalorder %s830_s17, %s826_s22 }
 0x117   : > { %p828_p0 = pnand %p827_p1, %p1075_p13  ;;  %p833_p4 = por %p832_p8, %p831_p7 }
 0x119   : > { %p829_p3 = pneg %p828_p0 }
 0x11b   : > { %p834_p12 = pnand %p833_p4, %p829_p3 }
 0x11d   : > { %837 = shalt.err (!%p834_p12)
}
 0x11e   : > { %s891_s19 = smov 128   ;;  %s892_s5 = smov 8  }
 0x11f   : > { %428 = dma.vmem_to_hbm [thread:$0]  (%p1075_p13), %s1085_s10, %s596_s11, %s1087_s28, %s401_s26, %s891_s19, %s891_s19, %s892_s5  }
 0x120 PF: > { %s437_s9 = sand.u32 1, %s869_s12   ;;  %p1144_p6 = scmp.ne.s32.totalorder %s1138_s25, 0 }
 0x121   : > { %p1145_p11 = scmp.ge.s32.totalorder %s881_s15, 2  ;;  %s438_s6 = scalar_lea.sflag [#allocation4], %s437_s9 }
 0x123   : > { %p653_p2 = pnand %p1145_p11, %p1144_p6 }
 0x125   : > { %p654_p5 = pneg %p653_p2 }
 0x127   : > { %864 = dma.done.wait (%p654_p5), %s438_s6, 384  }
 0x128   : > { %866 = vsyncadd (%p654_p5), %s438_s6, 4294966912  ;;  %p17_p9 = scmp.ge.s32.totalorder %s938_s18, 4   ;;  %s1146_s12 = smov %s873_s13 }
 0x129   : > { %s1147_s13 = smov %s877_s14  ;;  %s1148_s14 = smov %s950_s21 }
 0x12a   : > { %s1149_s15 = smov %s938_s18  ;;  %19 = sbr.rel (!%p17_p9) target bundleno = 6 (0x6), region = 85 }
 0x12f   :  { %444 = vsyncpa [#allocation3], 1 }
 0x130   :  { %446 = vsyncpa [#allocation3 + $0x1], 1 }
 0x131   :  { %447 = vsyncpa [#allocation6], 1 }
 0x132   :  { %448 = vsyncpa [#allocation4], 1 }
 0x133   :  { %450 = vsyncpa [#allocation4 + $0x1], 1 }

</bundles_post_ra>
